<compile_context>
chip_gen: v6e
topology: v6e:2x2x1
jax: 0.10.0
libtpu: 0.0.40
codegen_flags: <defaults>
</compile_context>

<pallas_src>
import jax
import jax.numpy as jnp
from jax.experimental import pallas as pl
from jax.experimental.pallas import tpu as pltpu


def _l1_norm_kernel(x_ref, o_ref):
    x = x_ref[...]                                         # (tb, dim) tile, input dtype
    # Row L1 norm with f32 accumulation; |x| and the convert fuse into the
    # reduction element-wise, so no full-tile f32 temporary is materialized.
    l1 = jnp.sum(jnp.abs(x), axis=-1, keepdims=True, dtype=jnp.float32)  # (tb, 1)
    # Exact reciprocal of a (tb, 1) column — negligible cost at this width;
    # kept exact so the result matches the reference divide to the last ulp.
    inv = pl.reciprocal(l1, approx=False)
    # Multiply in the input dtype (no-op cast for f32; bf16 stays on the bf16
    # VPU path for v6e/v7x). Rows with l1 == 0 yield inf/nan, matching the
    # unguarded CUDA reference.
    o_ref[...] = (x * inv.astype(x.dtype)).astype(o_ref.dtype)


def _sublane_rows(dtype) -> int:
    # Native sublane packing: 8 rows for 4-byte, 16 for 2-byte, 32 for 1-byte dtypes.
    return max(8, 32 // jnp.dtype(dtype).itemsize)


def l1_normalize(
    x: jax.Array,
    *,
    target_block_bytes: int = 8 * 1024 * 1024,   # ~8 MiB/block -> ~32 MiB live (2 arrays x 2 buffers)
    vmem_limit_bytes: int = 40 * 1024 * 1024,    # headroom above that; safe on v5e/v6e/v7x (64 MiB/TC min)
) -> jax.Array:
    """L1-normalize each row of a (batch, dim) array with a Pallas TPU kernel."""
    batch, dim = x.shape
    itemsize = x.dtype.itemsize
    sub = _sublane_rows(x.dtype)
    bytes_per_row = max(1, dim * itemsize)

    # Largest batch tile that keeps each block near target_block_bytes.
    tb = max(1, target_block_bytes // bytes_per_row)

    # Guarantee >= 2 grid blocks whenever the batch can be split legally, so a
    # 2-TensorCore chip (v7x) shards the "parallel" grid axis across both cores.
    if batch > sub:
        half = ((pl.cdiv(batch, 2) + sub - 1) // sub) * sub
        tb = min(tb, half)

    if tb >= batch:
        tb = batch                                 # single full-extent block (always layout-legal)
    else:
        tb = max(sub, (tb // sub) * sub)           # dtype-aware sublane alignment

    grid = pl.cdiv(batch, tb)                      # partial last block handled by Pallas

    cost = pl.CostEstimate(
        flops=3 * batch * dim,                     # abs + add + mul per element
        transcendentals=batch,                     # one reciprocal per row
        bytes_accessed=2 * batch * dim * itemsize, # one read + one write per element
    )

    # NOTE: for dim far from a multiple of 128 (or < 128) a wrapper-side reshape
    # folding rows into the lane axis would give lane-dense stores; not needed
    # for the wide-dim shapes this module targets.
    return pl.pallas_call(
        _l1_norm_kernel,
        out_shape=jax.ShapeDtypeStruct((batch, dim), x.dtype),
        grid=(grid,),
        in_specs=[pl.BlockSpec((tb, dim), lambda i: (i, 0))],
        out_specs=pl.BlockSpec((tb, dim), lambda i: (i, 0)),
        compiler_params=pltpu.CompilerParams(
            dimension_semantics=("parallel",),
            vmem_limit_bytes=vmem_limit_bytes,
        ),
        cost_estimate=cost,
    )(x)


if __name__ == "__main__":
    key = jax.random.PRNGKey(0)

    # Small shape consistent with the module's (batch_size, dim) input.
    # batch=16 with default tiling yields a 2-block grid (exercises megacore split).
    batch, dim = 16, 256
    x = jax.random.normal(key, (batch, dim), dtype=jnp.float32)

    out = jax.block_until_ready(l1_normalize(x))
    ref = x / jnp.sum(jnp.abs(x), axis=1, keepdims=True)
    assert out.shape == x.shape
    assert jnp.allclose(out, ref, atol=1e-6, rtol=1e-6), "mismatch vs reference (f32)"

    # Exercise the multi-block / partial-last-block (cdiv) path with a batch
    # that is not a multiple of the tile, using a deliberately tiny block size.
    batch2, dim2 = 20, 256
    x2 = jax.random.normal(jax.random.PRNGKey(1), (batch2, dim2), dtype=jnp.float32)
    out2 = jax.block_until_ready(l1_normalize(x2, target_block_bytes=8 * 1024))
    ref2 = x2 / jnp.sum(jnp.abs(x2), axis=1, keepdims=True)
    assert jnp.allclose(out2, ref2, atol=1e-6, rtol=1e-6), "mismatch vs reference (partial block)"

    # Exercise the dtype-aware (16-row sublane) bf16 path with loose tolerance.
    batch3, dim3 = 24, 128
    x3 = jax.random.normal(jax.random.PRNGKey(2), (batch3, dim3), dtype=jnp.float32)
    out3 = jax.block_until_ready(l1_normalize(x3.astype(jnp.bfloat16)))
    ref3 = x3 / jnp.sum(jnp.abs(x3), axis=1, keepdims=True)
    assert jnp.allclose(out3.astype(jnp.float32), ref3, rtol=5e-2, atol=5e-3), "mismatch vs reference (bf16)"

    print("KERNEL_OK")
</pallas_src>

<mosaic_0001>
module attributes {stable_mosaic.version = 11 : i64} {
  func.func @_l1_norm_kernel(%arg0: i32, %arg1: memref<8x256xf32, #tpu.memory_space<vmem>>, %arg2: memref<8x256xf32, #tpu.memory_space<vmem>>) attributes {dimension_semantics = [#tpu.dimension_semantics<parallel>], iteration_bounds = array<i64: 2>, scalar_prefetch = 0 : i64, scratch_operands = 0 : i64, tpu.core_type = #tpu.core_type<tc>, window_params = [{transform_indices = @transform_0, window_bounds = array<i64: 8, 256>}, {transform_indices = @transform_1, window_bounds = array<i64: 8, 256>}]} {
    %c0 = arith.constant 0 : index
    %c0_0 = arith.constant 0 : index
    %0 = vector.load %arg1[%c0, %c0_0] : memref<8x256xf32, #tpu.memory_space<vmem>>, vector<8x256xf32>
    %1 = math.absf %0 : vector<8x256xf32>
    %cst = arith.constant dense<0.000000e+00> : vector<8xf32>
    %2 = vector.multi_reduction <add>, %1, %cst [1] : vector<8x256xf32> to vector<8xf32>
    %3 = vector.shape_cast %2 : vector<8xf32> to vector<8x1xf32>
    %4 = tpu.reciprocal %3 : vector<8x1xf32> -> vector<8x1xf32>
    %5 = vector.broadcast %4 : vector<8x1xf32> to vector<8x256xf32>
    %6 = arith.mulf %0, %5 : vector<8x256xf32>
    %c0_1 = arith.constant 0 : index
    %c0_2 = arith.constant 0 : index
    %7 = vector.load %arg2[%c0_1, %c0_2] : memref<8x256xf32, #tpu.memory_space<vmem>>, vector<8x256xf32>
    tpu.vector_store %arg2[%c0_1, %c0_2], %6 {strides = array<i32>} : memref<8x256xf32, #tpu.memory_space<vmem>>, vector<8x256xf32>,
    return
  }
  func.func @transform_0(%arg0: i32) -> (i32, i32) {
    %c0_i32 = arith.constant 0 : i32
    %c0_i32_0 = arith.constant 0 : i32
    return %arg0, %c0_i32 : i32, i32
  }
  func.func @transform_1(%arg0: i32) -> (i32, i32) {
    %c0_i32 = arith.constant 0 : i32
    %c0_i32_0 = arith.constant 0 : i32
    return %arg0, %c0_i32 : i32, i32
  }
}

</mosaic_0001>

<bundles_post_ra>
// kernel: tpu_custom_call.1
= control target key start
LH: loop header
LB: loop body
LE: loop exit
PB: predicated region body
PF: predicated region fallthrough
CT: control target
= control target key end

     0   :  { %6 = vsyncpa [#allocation3], 0  ;;  %s547_s0 = inlined_call_operand.hbm [shape: f32[16,256], index: 0, kind: input, shape index: {}]   ;;  %s548_s1 = inlined_call_operand.hbm [shape: f32[16,256], index: 1, kind: output, shape index: {}]  }
   0x1   :  { %8 = vsyncpa [#allocation3 + $0x1], 0 }
   0x2   :  { %9 = vsyncpa [#allocation4], 0 }
   0x3   :  { %11 = vsyncpa [#allocation4 + $0x1], 0  ;;  %s400_s6 = smov 0   ;;  %s402_s7 = smov 0  }
   0x4   :  { %s404_s8 = smov 0   ;;  %s406_s9 = smov 0  }
   0x5 LB: > { %s421_s10 = sadd.s32 4294967295, %s386_s9   ;;  %s230_s11 = sadd.s32 4294967294, %s386_s9   ;;  %s386_s9 = sphi %s406_s9, %s565_s9   ;;  %s382_s8 = sphi %s404_s8, %s564_s8   ;;  %s378_s7 = sphi %s402_s7, %s563_s7   ;;  %s374_s6 = sphi %s400_s6, %s562_s6  }
   0x6   : > { %s425_s12 = sadd.s32 1, %s386_s9   ;;  %s24_s13 = sadd.s32 1, %s382_s8 }
   0x7   : > { %s21_s14 = ssub.s32 %s386_s9, %s425_s12  ;;  %p31_p0 = scmp.ne.s32.totalorder %s382_s8, %s378_s7 }
   0x8   : > { %p22_p1 = scmp.eq.s32.totalorder %s21_s14, 0  ;;  %p32_p2 = scmp.eq.s32.totalorder %s386_s9, 0 }
   0x9   : > { %p37_p3 = scmp.ne.s32.totalorder %s378_s7, %s374_s6  ;;  %p38_p4 = scmp.eq.s32.totalorder %s421_s10, 0 }
   0xa   : > { %s437_s15 = scalar_select %p22_p1, %s382_s8, %s24_s13  }
   0xb   : > { %p439_p5 = por %p32_p2, %p31_p0  ;;  %p443_p6 = por %p38_p4, %p37_p3 }
   0xc   : > { %p61_p7 = scmp.eq.s32.totalorder %s421_s10, 1  ;;  %p67_p8 = scmp.eq.s32.totalorder %s230_s11, 1 }
   0xd   : > { %s552_s17 = scalar_select %p443_p6, 1, 0 }
   0xe   : > { %p258_p10 = scmp.lt.s32.totalorder %s386_s9, 2  ;;  %p450_p11 = por %p61_p7, %p31_p0 }
   0xf   : > { %p454_p12 = por %p67_p8, %p37_p3  ;;  %s87_s20 = sand.u32 1, %s382_s8  }
  0x10   : > { %s553_s18 = scalar_select %p450_p11, 1, 0 }
  0x11   : > { %s554_s19 = scalar_select %p454_p12, 1, 0 }
  0x12   : > { %s244_s21 = sshll.u32 %s386_s9, 8  ;;  %s233_s22 = sshll.u32 %s87_s20, 4 }
  0x13   : > { %s463_s25 = scalar_lea.hbm %s547_s0, %s244_s21  ;;  %s91_s26 = scalar_lea.vmem [#allocation2], %s233_s22 }
  0x14   : > { %s99_s27 = sshll.u32 %s91_s26, 4  ;;  %p467_p13 = pnand %p258_p10, %p439_p5  ;;  %s471_s27 = int_to_ptr.vmem [resolvable:$true] %s99_s27 }
  0x15   : > { %s88_s29 = scalar_lea.sflag [#allocation3], %s87_s20  ;;  %s294_s30 = scalar_lea.hbm %s463_s25, 256 }
  0x16   : > { %p295_p2 = scmp.ne.s32.totalorder %s463_s25, %s294_s30  ;;  %p296_p3 = pneg %p467_p13 }
  0x17   : > { %s299_s4 = scalar_lea.hbm %s547_s0, 512  ;;  %p300_p5 = scmp.lt.s32.totalorder %s463_s25, %s547_s0 }
  0x18   : > { %p297_p4 = pnand %p296_p3, %p295_p2  ;;  %p301_p8 = scmp.lt.s32.totalorder %s299_s4, %s294_s30 }
  0x1a   : > { %p298_p7 = pneg %p297_p4  ;;  %p302_p10 = por %p301_p8, %p300_p5 }
  0x1c   : > { %p303_p9 = pnand %p302_p10, %p298_p7 }
  0x1e   : > { %306 = shalt.err (!%p303_p9)
}
  0x1f   : > { %s307_s13 = scalar_lea.vmem %s471_s27, 256  ;;  %s388_s14 = smov [#allocation2]  }
  0x20   : > { %p308_p0 = scmp.ne.s32.totalorder %s471_s27, %s307_s13  ;;  %s312_s16 = sshll.u32 %s388_s14, 4  ;;  %s313_s16 = int_to_ptr.vmem [resolvable:$false] %s312_s16 }
  0x21   : > { %s314_s20 = scalar_lea.vmem %s313_s16, 512  ;;  %p315_p4 = scmp.lt.s32.totalorder %s471_s27, %s313_s16 }
  0x22   : > { %p310_p1 = pnand %p308_p0, %p296_p3  ;;  %p316_p12 = scmp.lt.s32.totalorder %s314_s20, %s307_s13 }
  0x24   : > { %p311_p2 = pneg %p310_p1  ;;  %p317_p11 = por %p316_p12, %p315_p4 }
  0x26   : > { %p318_p6 = pnand %p317_p11, %p311_p2 }
  0x28   : > { %321 = shalt.err (!%p318_p6)
}
  0x29   : > { %253 = dma.hbm_to_vmem [thread:$0]  (!%p467_p13), %s463_s25, 256, %s471_s27, %s88_s29  }
  0x2a   : > { %p556_p9 = scmp.lt.s32.totalorder %s386_s9, 3  ;;  %p557_p7 = scmp.ge.s32.totalorder %s386_s9, 1 }
  0x2c   : > { %p105_p0 = pnand %p557_p7, %p556_p9 }
  0x2d   : > { %s498_s21 = sand.u32 (!%p105_p0), 1, %s378_s7   ;;  %p558_p6 = scmp.ne.s32.totalorder (!%p105_p0), %s552_s17, 0 }
  0x2e   : > { %108 = sbr.rel (%p105_p0) target bundleno = 224 (0xe0), region = 24  ;;  %s237_s22 = sshll.u32 (!%p105_p0), %s498_s21, 4 }
  0x2f   : > { %s111_s23 = scalar_lea.sflag (!%p105_p0), [#allocation3], %s498_s21  ;;  %s114_s24 = scalar_lea.vmem (!%p105_p0), [#allocation2], %s237_s22 }
  0x33   : > { %365 = dma.done.wait (%p558_p6), %s111_s23, 256  }
  0x34   : > { %367 = vsyncadd (%p558_p6), %s111_s23, 4294967040  ;;  %v133_v0 = vld [vmem:[%s114_s24] sm:$0xff]  ;;  %v134_v1 = vld [vmem:[%s114_s24 + $0x8] sm:$0xff]  ;;  %s245_s25 = sshll.u32 %s421_s10, 8  ;;  %s132_s26 = scalar_lea.vmem [#allocation5], %s237_s22 }
  0x35   : > { %v135_v2 = vand.u32 2147483647, %v133_v0  ;;  %v136_v3 = vand.u32 2147483647, %v134_v1  ;;  %s160_s27 = sshll.u32 %s132_s26, 4  ;;  %s510_s29 = scalar_lea.hbm %s548_s1, %s245_s25  ;;  %s161_s27 = int_to_ptr.vmem [resolvable:$true] %s160_s27 }
  0x36   : > { %s146_s30 = scalar_lea.sflag [#allocation4], %s498_s21  ;;  %s322_s2 = scalar_lea.vmem %s161_s27, 256 }
  0x37   : > { %v137_v4 = vadd.f32 %v136_v3, %v135_v2  ;;  %p323_p11 = scmp.ne.s32.totalorder %s161_s27, %s322_s2  ;;  %p559_p12 = scmp.ne.s32.totalorder %s553_s18, 0 }
  0x38   : > { %s389_s10 = smov [#allocation5]  }
  0x39   : > { %138 = vadd.xlane.f32.xlu0 %v137_v4  ;;  %p324_p13 = pnand %p323_p11, %p559_p12  ;;  %s326_s3 = sshll.u32 %s389_s10, 4  ;;  %s327_s3 = int_to_ptr.vmem [resolvable:$false] %s326_s3 }
  0x3a   : > { %s328_s4 = scalar_lea.vmem %s327_s3, 512  ;;  %p329_p3 = scmp.lt.s32.totalorder %s161_s27, %s327_s3 }
  0x3b   : > { %p325_p1 = pneg %p324_p13  ;;  %p330_p5 = scmp.lt.s32.totalorder %s328_s4, %s322_s2 }
  0x3d   : > { %p331_p8 = por %p330_p5, %p329_p3 }
  0x3f   : > { %p332_p10 = pnand %p331_p8, %p325_p1 }
  0xc2   : > { %v139_v5 = vpop.xlane.xlu0 %138 }
  0xc3   : > { %292 = vrcp.f32 %v139_v5 }
  0xd0   : > { %v293_v6 = vpop.eup %292 }
  0xd1   : > { %v141_v7 = vmul.f32 %v293_v6, %v133_v0  ;;  %v142_v8 = vmul.f32 %v293_v6, %v134_v1 }
  0xd3   : > { %143 = vst [vmem:[%s132_s26] sm:$0xff] %v141_v7  ;;  %144 = vst [vmem:[%s132_s26 + $0x8] sm:$0xff] %v142_v8 }
  0xd4   : > { %335 = shalt.err (!%p332_p10)
}
  0xd5   : > { %s336_s5 = scalar_lea.hbm %s510_s29, 256  ;;  %s340_s14 = scalar_lea.hbm %s548_s1, 512 }
  0xd6   : > { %p337_p2 = scmp.ne.s32.totalorder %s510_s29, %s336_s5  ;;  %p341_p7 = scmp.lt.s32.totalorder %s510_s29, %s548_s1 }
  0xd7   : > { %p342_p0 = scmp.lt.s32.totalorder %s340_s14, %s336_s5 }
  0xd8   : > { %p338_p4 = pnand %p337_p2, %p559_p12 }
  0xd9   : > { %p343_p6 = por %p342_p0, %p341_p7 }
  0xda   : > { %p339_p9 = pneg %p338_p4 }
  0xdc   : > { %p344_p11 = pnand %p343_p6, %p339_p9 }
  0xde   : > { %347 = shalt.err (!%p344_p11)
}
  0xdf   : > { %248 = dma.vmem_to_hbm [thread:$0]  (%p559_p12), %s161_s27, 256, %s510_s29, %s146_s30  }
  0xe0 PF: > { %s172_s21 = sand.u32 1, %s374_s6   ;;  %p560_p13 = scmp.ne.s32.totalorder %s554_s19, 0 }
  0xe1   : > { %p561_p1 = scmp.ge.s32.totalorder %s386_s9, 2  ;;  %s173_s22 = scalar_lea.sflag [#allocation4], %s172_s21 }
  0xe3   : > { %p255_p3 = pnand %p561_p1, %p560_p13 }
  0xe5   : > { %p256_p5 = pneg %p255_p3 }
  0xe7   : > { %369 = dma.done.wait (%p256_p5), %s173_s22, 256  }
  0xe8   : > { %371 = vsyncadd (%p256_p5), %s173_s22, 4294967040  ;;  %p14_p8 = scmp.ge.s32.totalorder %s425_s12, 4   ;;  %s562_s6 = smov %s378_s7 }
  0xe9   : > { %s563_s7 = smov %s382_s8  ;;  %s564_s8 = smov %s437_s15 }
  0xea   : > { %s565_s9 = smov %s425_s12  ;;  %16 = sbr.rel (!%p14_p8) target bundleno = 5 (0x5), region = 69 }
  0xef   :  { %178 = vsyncpa [#allocation3], 1 }
  0xf0   :  { %180 = vsyncpa [#allocation3 + $0x1], 1 }
  0xf1   :  { %181 = vsyncpa [#allocation4], 1 }
  0xf2   :  { %183 = vsyncpa [#allocation4 + $0x1], 1 }

</bundles_post_ra>
